<compile_context>
chip_gen: v6e
topology: v6e:2x2x1
jax: 0.10.0
libtpu: 0.0.40
codegen_flags: <defaults>
</compile_context>

<pallas_src>
import functools
import math

import jax
import jax.numpy as jnp
from jax.experimental import pallas as pl
from jax.experimental.pallas import tpu as pltpu

_HALF_LOG_2PI = 0.5 * math.log(2.0 * math.pi)
_LANE = 128


def _softplus(x):
    # Matches torch.nn.functional.softplus(beta=1, threshold=20).
    return jnp.where(x > 20.0, x, jnp.log1p(jnp.exp(jnp.minimum(x, 20.0))))


def _round_up(n, m):
    return ((n + m - 1) // m) * m


def actor_kernel(x_ref, w1_ref, b1_ref, wh_ref, bh_ref, eps_ref,
                 action_ref, logp_ref, *, action_bound, a_pad):
    x = x_ref[...]                                                   # (TB, S)

    # fc1 + relu  (H padded to a multiple of 128; padded columns stay 0)
    h = jnp.dot(x, w1_ref[...], preferred_element_type=jnp.float32) + b1_ref[...]
    h = jnp.maximum(h, 0.0)                                          # (TB, Hp)

    # fused mu/std heads: one matmul into a (TB, 2*A_pad) slab
    heads = jnp.dot(h, wh_ref[...], preferred_element_type=jnp.float32) + bh_ref[...]
    mu = heads[:, :a_pad]                                            # (TB, Ap)
    std = _softplus(heads[:, a_pad:])                                # (TB, Ap)

    # Normal(mu, std).rsample() == mu + std * eps, eps ~ N(0, 1)
    eps = eps_ref[...]
    z = mu + std * eps

    # Normal(mu, std).log_prob(z): (z - mu)/std == eps exactly by construction.
    log_prob = -0.5 * jnp.square(eps) - jnp.log(std) - _HALF_LOG_2PI

    # action = tanh(z); tanh-squash correction exactly as in the torch code
    # (the reference applies tanh twice in the correction term -> keep parity).
    t = jnp.tanh(z)
    log_prob = log_prob - jnp.log(1.0 - jnp.square(jnp.tanh(t)) + 1e-07)

    action_ref[...] = (t * action_bound).astype(action_ref.dtype)
    logp_ref[...] = log_prob.astype(logp_ref.dtype)


def actor_continuous_forward(x, params, eps, action_bound):
    """Pallas implementation of ActorContinuous.forward.

    Args:
      x:      (B, state_size) float32
      params: dict with w1 (S,H), b1 (H,), w_mu (H,A), b_mu (A,),
              w_std (H,A), b_std (A,)   -- weights stored as (in, out)
      eps:    (B, action_size) float32 standard-normal noise for rsample()
      action_bound: python float
    Returns:
      (action, log_prob), each (B, action_size) float32.
    """
    B, S = x.shape
    H = params["w1"].shape[1]
    A = params["w_mu"].shape[1]

    # ---- wrapper-side padding / packing (pure layout plumbing) -------------
    H_pad = _round_up(H, _LANE)
    A_pad = _round_up(A, _LANE)

    w1 = jnp.zeros((S, H_pad), jnp.float32).at[:, :H].set(params["w1"])
    b1 = jnp.zeros((1, H_pad), jnp.float32).at[0, :H].set(params["b1"])

    # Fused head weight: [w_mu | w_std], each padded to A_pad lanes.
    w_head = (jnp.zeros((H_pad, 2 * A_pad), jnp.float32)
              .at[:H, :A].set(params["w_mu"])
              .at[:H, A_pad:A_pad + A].set(params["w_std"]))
    b_head = (jnp.zeros((1, 2 * A_pad), jnp.float32)
              .at[0, :A].set(params["b_mu"])
              .at[0, A_pad:A_pad + A].set(params["b_std"]))

    # Batch tiling: TILE_B rows per grid step (multiple of 8 sublanes).
    B8 = _round_up(B, 8)
    TILE_B = min(B8, 512)
    B_pad = _round_up(B8, TILE_B)
    n_b = B_pad // TILE_B

    x_p = jnp.zeros((B_pad, S), jnp.float32).at[:B, :].set(x)
    eps_p = jnp.zeros((B_pad, A_pad), jnp.float32).at[:B, :A].set(eps)

    kernel = functools.partial(actor_kernel,
                               action_bound=float(action_bound), a_pad=A_pad)

    vmem = pltpu.MemorySpace.VMEM
    in_specs = [
        pl.BlockSpec((TILE_B, S), lambda i: (i, 0), memory_space=vmem),          # x
        pl.BlockSpec((S, H_pad), lambda i: (0, 0), memory_space=vmem),           # w1
        pl.BlockSpec((1, H_pad), lambda i: (0, 0), memory_space=vmem),           # b1
        pl.BlockSpec((H_pad, 2 * A_pad), lambda i: (0, 0), memory_space=vmem),   # w_head
        pl.BlockSpec((1, 2 * A_pad), lambda i: (0, 0), memory_space=vmem),       # b_head
        pl.BlockSpec((TILE_B, A_pad), lambda i: (i, 0), memory_space=vmem),      # eps
    ]
    out_specs = (
        pl.BlockSpec((TILE_B, A_pad), lambda i: (i, 0), memory_space=vmem),      # action
        pl.BlockSpec((TILE_B, A_pad), lambda i: (i, 0), memory_space=vmem),      # log_prob
    )
    out_shape = (
        jax.ShapeDtypeStruct((B_pad, A_pad), jnp.float32),
        jax.ShapeDtypeStruct((B_pad, A_pad), jnp.float32),
    )

    # Advisory cost estimate so XLA schedules this tiny kernel tightly.
    flops = 2 * B_pad * (S * H_pad + H_pad * 2 * A_pad)
    transcendentals = 6 * B_pad * A_pad            # exp, log1p, log, 2*tanh, log
    bytes_accessed = 4 * (x_p.size + w1.size + b1.size + w_head.size
                          + b_head.size + eps_p.size + 2 * B_pad * A_pad)

    action_p, logp_p = pl.pallas_call(
        kernel,
        out_shape=out_shape,
        grid=(n_b,),
        in_specs=in_specs,
        out_specs=out_specs,
        compiler_params=pltpu.CompilerParams(
            dimension_semantics=("parallel",),
            vmem_limit_bytes=32 * 1024 * 1024,   # budget against v7x's smaller VMEM
        ),
        cost_estimate=pl.CostEstimate(
            flops=flops, transcendentals=transcendentals,
            bytes_accessed=bytes_accessed),
    )(x_p, w1, b1, w_head, b_head, eps_p)

    return action_p[:B, :A], logp_p[:B, :A]


def init_params(key, state_size, hidden_size, action_size):
    """Deterministic synthetic init (PyTorch Linear-style uniform fan-in)."""
    ks = jax.random.split(key, 6)

    def linear(kw, kb, fan_in, fan_out):
        bound = 1.0 / math.sqrt(fan_in)
        w = jax.random.uniform(kw, (fan_in, fan_out), jnp.float32, -bound, bound)
        b = jax.random.uniform(kb, (fan_out,), jnp.float32, -bound, bound)
        return w, b

    w1, b1 = linear(ks[0], ks[1], state_size, hidden_size)
    w_mu, b_mu = linear(ks[2], ks[3], hidden_size, action_size)
    w_std, b_std = linear(ks[4], ks[5], hidden_size, action_size)
    return {"w1": w1, "b1": b1, "w_mu": w_mu, "b_mu": b_mu,
            "w_std": w_std, "b_std": b_std}


if __name__ == "__main__":
    # Small shapes consistent with the module: batch=8, state=16, hidden=32, action=8.
    B, S, H, A = 8, 16, 32, 8
    ACTION_BOUND = 2.0

    key = jax.random.PRNGKey(0)
    k_x, k_p, k_eps = jax.random.split(key, 3)

    x = jax.random.normal(k_x, (B, S), jnp.float32)
    params = init_params(k_p, S, H, A)
    eps = jax.random.normal(k_eps, (B, A), jnp.float32)  # rsample() noise

    action, log_prob = actor_continuous_forward(x, params, eps, ACTION_BOUND)
    jax.block_until_ready((action, log_prob))

    # Pure-JAX reference of the exact torch math (same eps).
    h_ref = jnp.maximum(x @ params["w1"] + params["b1"], 0.0)
    mu_ref = h_ref @ params["w_mu"] + params["b_mu"]
    std_pre = h_ref @ params["w_std"] + params["b_std"]
    std_ref = jnp.where(std_pre > 20.0, std_pre,
                        jnp.log1p(jnp.exp(jnp.minimum(std_pre, 20.0))))
    z_ref = mu_ref + std_ref * eps
    lp_ref = (-0.5 * ((z_ref - mu_ref) / std_ref) ** 2
              - jnp.log(std_ref) - 0.5 * math.log(2.0 * math.pi))
    a_ref = jnp.tanh(z_ref)
    lp_ref = lp_ref - jnp.log(1.0 - jnp.tanh(a_ref) ** 2 + 1e-07)  # torch double-tanh
    a_ref = a_ref * ACTION_BOUND

    assert jnp.allclose(action, a_ref, atol=1e-5, rtol=1e-5)
    assert jnp.allclose(log_prob, lp_ref, atol=1e-5, rtol=1e-5)

    print("KERNEL_OK")
</pallas_src>

<mosaic_0001>
module attributes {stable_mosaic.version = 11 : i64} {
  func.func @actor_kernel(%arg0: i32, %arg1: memref<8x16xf32, #tpu.memory_space<vmem>>, %arg2: memref<16x128xf32, #tpu.memory_space<vmem>>, %arg3: memref<1x128xf32, #tpu.memory_space<vmem>>, %arg4: memref<128x256xf32, #tpu.memory_space<vmem>>, %arg5: memref<1x256xf32, #tpu.memory_space<vmem>>, %arg6: memref<8x128xf32, #tpu.memory_space<vmem>>, %arg7: memref<8x128xf32, #tpu.memory_space<vmem>>, %arg8: memref<8x128xf32, #tpu.memory_space<vmem>>) attributes {dimension_semantics = [#tpu.dimension_semantics<parallel>], iteration_bounds = array<i64: 1>, scalar_prefetch = 0 : i64, scratch_operands = 0 : i64, tpu.core_type = #tpu.core_type<tc>, window_params = [{transform_indices = @transform_0, window_bounds = array<i64: 8, 16>}, {pipeline_mode = #tpu.pipeline_mode<synchronous>, transform_indices = @transform_1, window_bounds = array<i64: 16, 128>}, {pipeline_mode = #tpu.pipeline_mode<synchronous>, transform_indices = @transform_2, window_bounds = array<i64: 1, 128>}, {pipeline_mode = #tpu.pipeline_mode<synchronous>, transform_indices = @transform_3, window_bounds = array<i64: 128, 256>}, {pipeline_mode = #tpu.pipeline_mode<synchronous>, transform_indices = @transform_4, window_bounds = array<i64: 1, 256>}, {transform_indices = @transform_5, window_bounds = array<i64: 8, 128>}, {transform_indices = @transform_6, window_bounds = array<i64: 8, 128>}, {transform_indices = @transform_7, window_bounds = array<i64: 8, 128>}]} {
    %c0 = arith.constant 0 : index
    %c0_0 = arith.constant 0 : index
    %0 = vector.load %arg1[%c0, %c0_0] : memref<8x16xf32, #tpu.memory_space<vmem>>, vector<8x16xf32>
    %c0_1 = arith.constant 0 : index
    %c0_2 = arith.constant 0 : index
    %1 = vector.load %arg2[%c0_1, %c0_2] : memref<16x128xf32, #tpu.memory_space<vmem>>, vector<16x128xf32>
    %cst = arith.constant dense<0.000000e+00> : vector<8x128xf32>
    %2 = tpu.matmul %0, %1, %cst {dimension_numbers = #tpu.dot_dimension_numbers<[1], [0], [0], [1], [0, 0, 1, 1], [], []>} : vector<8x16xf32>, vector<16x128xf32>, vector<8x128xf32> -> vector<8x128xf32>
    %c0_3 = arith.constant 0 : index
    %c0_4 = arith.constant 0 : index
    %3 = vector.load %arg3[%c0_3, %c0_4] : memref<1x128xf32, #tpu.memory_space<vmem>>, vector<1x128xf32>
    %4 = vector.broadcast %3 : vector<1x128xf32> to vector<8x128xf32>
    %5 = arith.addf %2, %4 : vector<8x128xf32>
    %cst_5 = arith.constant 0.000000e+00 : f32
    %6 = vector.broadcast %cst_5 : f32 to vector<8x128xf32>
    %7 = arith.maximumf %5, %6 : vector<8x128xf32>
    %c0_6 = arith.constant 0 : index
    %c0_7 = arith.constant 0 : index
    %8 = vector.load %arg4[%c0_6, %c0_7] : memref<128x256xf32, #tpu.memory_space<vmem>>, vector<128x256xf32>
    %cst_8 = arith.constant dense<0.000000e+00> : vector<8x256xf32>
    %9 = tpu.matmul %7, %8, %cst_8 {dimension_numbers = #tpu.dot_dimension_numbers<[1], [0], [0], [1], [0, 0, 1, 1], [], []>} : vector<8x128xf32>, vector<128x256xf32>, vector<8x256xf32> -> vector<8x256xf32>
    %c0_9 = arith.constant 0 : index
    %c0_10 = arith.constant 0 : index
    %10 = vector.load %arg5[%c0_9, %c0_10] : memref<1x256xf32, #tpu.memory_space<vmem>>, vector<1x256xf32>
    %11 = vector.broadcast %10 : vector<1x256xf32> to vector<8x256xf32>
    %12 = arith.addf %9, %11 : vector<8x256xf32>
    %13 = vector.extract_strided_slice %12 {offsets = [0, 0], sizes = [8, 128], strides = [1, 1]} : vector<8x256xf32> to vector<8x128xf32>
    %14 = vector.extract_strided_slice %12 {offsets = [0, 128], sizes = [8, 128], strides = [1, 1]} : vector<8x256xf32> to vector<8x128xf32>
    %cst_11 = arith.constant 2.000000e+01 : f32
    %15 = vector.broadcast %cst_11 : f32 to vector<8x128xf32>
    %16 = arith.cmpf ogt, %14, %15 : vector<8x128xf32>
    %cst_12 = arith.constant 2.000000e+01 : f32
    %17 = vector.broadcast %cst_12 : f32 to vector<8x128xf32>
    %18 = arith.minimumf %14, %17 : vector<8x128xf32>
    %19 = math.exp %18 : vector<8x128xf32>
    %20 = math.log1p %19 : vector<8x128xf32>
    %21 = arith.select %16, %14, %20 : vector<8x128xi1>, vector<8x128xf32>
    %c0_13 = arith.constant 0 : index
    %c0_14 = arith.constant 0 : index
    %22 = vector.load %arg6[%c0_13, %c0_14] : memref<8x128xf32, #tpu.memory_space<vmem>>, vector<8x128xf32>
    %23 = arith.mulf %21, %22 : vector<8x128xf32>
    %24 = arith.addf %13, %23 : vector<8x128xf32>
    %25 = arith.mulf %22, %22 : vector<8x128xf32>
    %cst_15 = arith.constant -5.000000e-01 : f32
    %26 = vector.broadcast %cst_15 : f32 to vector<8x128xf32>
    %27 = arith.mulf %26, %25 : vector<8x128xf32>
    %28 = math.log %21 : vector<8x128xf32>
    %29 = arith.subf %27, %28 : vector<8x128xf32>
    %cst_16 = arith.constant 0.918938517 : f32
    %30 = vector.broadcast %cst_16 : f32 to vector<8x128xf32>
    %31 = arith.subf %29, %30 : vector<8x128xf32>
    %32 = math.tanh %24 : vector<8x128xf32>
    %33 = math.tanh %32 : vector<8x128xf32>
    %34 = arith.mulf %33, %33 : vector<8x128xf32>
    %cst_17 = arith.constant 1.000000e+00 : f32
    %35 = vector.broadcast %cst_17 : f32 to vector<8x128xf32>
    %36 = arith.subf %35, %34 : vector<8x128xf32>
    %cst_18 = arith.constant 1.000000e-07 : f32
    %37 = vector.broadcast %cst_18 : f32 to vector<8x128xf32>
    %38 = arith.addf %36, %37 : vector<8x128xf32>
    %39 = math.log %38 : vector<8x128xf32>
    %40 = arith.subf %31, %39 : vector<8x128xf32>
    %cst_19 = arith.constant 2.000000e+00 : f32
    %41 = vector.broadcast %cst_19 : f32 to vector<8x128xf32>
    %42 = arith.mulf %32, %41 : vector<8x128xf32>
    %c0_20 = arith.constant 0 : index
    %c0_21 = arith.constant 0 : index
    %43 = vector.load %arg7[%c0_20, %c0_21] : memref<8x128xf32, #tpu.memory_space<vmem>>, vector<8x128xf32>
    tpu.vector_store %arg7[%c0_20, %c0_21], %42 {strides = array<i32>} : memref<8x128xf32, #tpu.memory_space<vmem>>, vector<8x128xf32>,
    %c0_22 = arith.constant 0 : index
    %c0_23 = arith.constant 0 : index
    %44 = vector.load %arg8[%c0_22, %c0_23] : memref<8x128xf32, #tpu.memory_space<vmem>>, vector<8x128xf32>
    tpu.vector_store %arg8[%c0_22, %c0_23], %40 {strides = array<i32>} : memref<8x128xf32, #tpu.memory_space<vmem>>, vector<8x128xf32>,
    return
  }
  func.func @transform_0(%arg0: i32) -> (i32, i32) {
    %c0_i32 = arith.constant 0 : i32
    %c0_i32_0 = arith.constant 0 : i32
    return %arg0, %c0_i32 : i32, i32
  }
  func.func @transform_1(%arg0: i32) -> (i32, i32) {
    %c0_i32 = arith.constant 0 : i32
    %c0_i32_0 = arith.constant 0 : i32
    %c0_i32_1 = arith.constant 0 : i32
    return %c0_i32, %c0_i32_0 : i32, i32
  }
  func.func @transform_2(%arg0: i32) -> (i32, i32) {
    %c0_i32 = arith.constant 0 : i32
    %c0_i32_0 = arith.constant 0 : i32
    %c0_i32_1 = arith.constant 0 : i32
    return %c0_i32, %c0_i32_0 : i32, i32
  }
  func.func @transform_3(%arg0: i32) -> (i32, i32) {
    %c0_i32 = arith.constant 0 : i32
    %c0_i32_0 = arith.constant 0 : i32
    %c0_i32_1 = arith.constant 0 : i32
    return %c0_i32, %c0_i32_0 : i32, i32
  }
  func.func @transform_4(%arg0: i32) -> (i32, i32) {
    %c0_i32 = arith.constant 0 : i32
    %c0_i32_0 = arith.constant 0 : i32
    %c0_i32_1 = arith.constant 0 : i32
    return %c0_i32, %c0_i32_0 : i32, i32
  }
  func.func @transform_5(%arg0: i32) -> (i32, i32) {
    %c0_i32 = arith.constant 0 : i32
    %c0_i32_0 = arith.constant 0 : i32
    return %arg0, %c0_i32 : i32, i32
  }
  func.func @transform_6(%arg0: i32) -> (i32, i32) {
    %c0_i32 = arith.constant 0 : i32
    %c0_i32_0 = arith.constant 0 : i32
    return %arg0, %c0_i32 : i32, i32
  }
  func.func @transform_7(%arg0: i32) -> (i32, i32) {
    %c0_i32 = arith.constant 0 : i32
    %c0_i32_0 = arith.constant 0 : i32
    return %arg0, %c0_i32 : i32, i32
  }
}

</mosaic_0001>

<bundles_post_ra>
// kernel: tpu_custom_call.1
= control target key start
LH: loop header
LB: loop body
LE: loop exit
PB: predicated region body
PF: predicated region fallthrough
CT: control target
= control target key end

     0   :  { %13 = vsyncpa [#allocation3], 0  ;;  %s586_s0 = inlined_call_operand.hbm [shape: f32[8,16], index: 0, kind: input, shape index: {}]   ;;  %s587_s1 = inlined_call_operand.hbm [shape: f32[16,128], index: 1, kind: input, shape index: {}]   ;;  %s588_s2 = inlined_call_operand.vmem [shape: f32[1,128], index: 2, kind: input, shape index: {}]   ;;  %s589_s3 = inlined_call_operand.hbm [shape: f32[128,256], index: 3, kind: input, shape index: {}]   ;;  %s590_s4 = inlined_call_operand.hbm [shape: f32[1,256], index: 4, kind: input, shape index: {}]   ;;  %s591_s5 = inlined_call_operand.vmem [shape: f32[8,128], index: 5, kind: input, shape index: {}]   ;;  %s592_s6 = inlined_call_operand.hbm [shape: f32[8,128], index: 6, kind: output, shape index: {0}]   ;;  %s593_s7 = inlined_call_operand.hbm [shape: f32[8,128], index: 7, kind: output, shape index: {1}]  }
   0x1   :  { %14 = vsyncpa [#allocation6], 0 }
   0x2   :  { %15 = vsyncpa [#allocation9], 0 }
   0x3   :  { %16 = vsyncpa [#allocation4], 0 }
   0x4   :  { %17 = vsyncpa [#allocation12], 0  ;;  %s510_s24 = smov [#allocation5]  }
   0x5   :  { %s33_s25 = sshll.u32 %s510_s24, 4  ;;  %s34_s25 = int_to_ptr.vmem [resolvable:$true] %s33_s25 }
   0x6   :  { %s388_s26 = scalar_lea.vmem %s34_s25, 256  ;;  %p393_p1 = scmp.lt.s32.totalorder %s34_s25, %s34_s25 }
   0x7   :  { %p389_p0 = scmp.ne.s32.totalorder %s34_s25, %s388_s26  ;;  %p394_p2 = scmp.lt.s32.totalorder %s388_s26, %s388_s26 }
   0x9   :  { %p395_p3 = por %p394_p2, %p393_p1 }
   0xb   :  { %p396_p4 = pnand %p395_p3, %p389_p0 }
   0xd   :  { %399 = shalt.err (!%p396_p4)
}
   0xe   :  { %s511_s27 = smov 128   ;;  %s512_s28 = smov 8  }
   0xf   :  { %39 = dma.hbm_to_vmem [thread:$0]  %s587_s1, 256, %s34_s25, [#allocation6], %s511_s27, %s511_s27, %s512_s28  }
  0x10   :  { %s513_s8 = smov [#allocation2]   ;;  %s514_s10 = smov [#allocation7]  }
  0x11   :  { %s24_s9 = sshll.u32 %s513_s8, 4  ;;  %s47_s11 = sshll.u32 %s514_s10, 4  ;;  %s25_s9 = int_to_ptr.vmem [resolvable:$true] %s24_s9  ;;  %s48_s11 = int_to_ptr.vmem [resolvable:$true] %s47_s11 }
  0x12   :  { %s408_s12 = scalar_lea.vmem %s25_s9, 128  ;;  %p413_p6 = scmp.lt.s32.totalorder %s25_s9, %s25_s9 }
  0x13   :  { %p409_p5 = scmp.ne.s32.totalorder %s25_s9, %s408_s12  ;;  %p414_p7 = scmp.lt.s32.totalorder %s408_s12, %s408_s12 }
  0x15   :  { %p415_p8 = por %p414_p7, %p413_p6 }
  0x17   :  { %p416_p9 = pnand %p415_p8, %p409_p5 }
  0x19   :  { %419 = shalt.err (!%p416_p9)
}
  0x1a   :  { %27 = dma.hbm_to_vmem [thread:$0]  %s586_s0, 128, %s25_s9, [#allocation3]  }
  0x1b   :  { %s428_s15 = scalar_lea.vmem %s48_s11, 4096  ;;  %p433_p11 = scmp.lt.s32.totalorder %s48_s11, %s48_s11 }
  0x1c   :  { %p429_p10 = scmp.ne.s32.totalorder %s48_s11, %s428_s15  ;;  %p434_p12 = scmp.lt.s32.totalorder %s428_s15, %s428_s15 }
  0x1e   :  { %p435_p13 = por %p434_p12, %p433_p11 }
  0x20   :  { %p436_p0 = pnand %p435_p13, %p429_p10 }
  0x22   :  { %439 = shalt.err (!%p436_p0)
}
  0x23   :  { %s515_s1 = smov 256   ;;  %s516_s16 = smov 16  }
  0x24   :  { %53 = dma.hbm_to_vmem [thread:$0]  %s589_s3, 4096, %s48_s11, [#allocation6], %s515_s1, %s515_s1, %s516_s16  }
  0x25   :  { %s517_s19 = smov [#allocation8]  }
  0x26   :  { %s60_s20 = sshll.u32 %s517_s19, 4  ;;  %s61_s20 = int_to_ptr.vmem [resolvable:$true] %s60_s20 }
  0x27   :  { %s448_s21 = scalar_lea.vmem %s61_s20, 32  ;;  %p453_p2 = scmp.lt.s32.totalorder %s61_s20, %s61_s20 }
  0x28   :  { %p449_p1 = scmp.ne.s32.totalorder %s61_s20, %s448_s21  ;;  %p454_p3 = scmp.lt.s32.totalorder %s448_s21, %s448_s21 }
  0x2a   :  { %p455_p4 = por %p454_p3, %p453_p2 }
  0x2c   :  { %p456_p5 = pnand %p455_p4, %p449_p1 }
  0x2e   :  { %459 = shalt.err (!%p456_p5)
}
  0x2f   :  { %63 = dma.hbm_to_vmem [thread:$0]  %s590_s4, 32, %s61_s20, [#allocation9]  }
  0x30   :  { %500 = dma.done.wait [#allocation3], 128  }
  0x31   :  { %501 = vsyncadd [#allocation3], 4294967168 }
  0x32   :  { %502 = dma.done.wait [#allocation6], 4352  }
  0x33   :  { %503 = vsyncadd [#allocation6], 4294962944 }
  0x34   :  { %504 = dma.done.wait [#allocation9], 32  }
  0x35   :  { %505 = vsyncadd [#allocation9], 4294967264  ;;  %v518_v0 = vmov 0.0   ;;  %vm519_vm0 = vmmov 0   ;;  %v80_v1 = vld [vmem:[#allocation5 + $0x8] sm:$0xff]  ;;  %v79_v2 = vld [vmem:[#allocation5] sm:$0xff]  ;;  %v197_v41 = vlaneseq }
  0x36   :  { %349 = vmatprep.subr.mxu0 %v518_v0  ;;  %353 = vmatprep.mubr.msk.f32.mxu0 %vm519_vm0, %v518_v0  ;;  %v78_v3 = vld [vmem:[#allocation2] sm:$0xff]  ;;  %vm88_vm1 = vcmask 130048   ;;  %v194_v4 = vld [vmem:[#allocation7 + $0xf8] sm:$0xff]  ;;  %v193_v5 = vld [vmem:[#allocation7 + $0xf0] sm:$0xff]  ;;  %s520_s24 = smov [#allocation10]  }
  0x37   :  { %271 = vmatprep.mubr.f32.mxu1 %v518_v0  ;;  %350 = vmatpush3.msra.mxu0 %v80_v1  ;;  %v192_v6 = vld [vmem:[#allocation7 + $0xe8] sm:$0xff]  ;;  %v191_v7 = vld [vmem:[#allocation7 + $0xe0] sm:$0xff]  ;;  %v190_v8 = vld [vmem:[#allocation7 + $0xd8] sm:$0xff]  ;;  %v198_v42 = vshrl.u32 %v197_v41, 7  ;;  %s318_s25 = sshll.u32 %s520_s24, 4  ;;  %s319_s25 = int_to_ptr.vmem [resolvable:$true] %s318_s25 }
  0x38   :  { %351 = vmatprep.subr.mxu0 %v518_v0  ;;  %207 = vmatprep.subr.mxu1 %v194_v4  ;;  %v189_v9 = vld [vmem:[#allocation7 + $0xd0] sm:$0xff]  ;;  %v188_v10 = vld [vmem:[#allocation7 + $0xc8] sm:$0xff]  ;;  %v187_v11 = vld [vmem:[#allocation7 + $0xc0] sm:$0xff]  ;;  %s460_s26 = scalar_lea.vmem %s319_s25, 128  ;;  %p465_p7 = scmp.lt.s32.totalorder %s319_s25, %s319_s25 }
  0x39   :  { %352 = vmatpush3.msra.mxu0 %v79_v2  ;;  %208 = vmatpush1.msra.mxu1 %v193_v5  ;;  %v186_v12 = vld [vmem:[#allocation7 + $0xb8] sm:$0xff]  ;;  %v185_v13 = vld [vmem:[#allocation7 + $0xb0] sm:$0xff]  ;;  %v184_v14 = vld [vmem:[#allocation7 + $0xa8] sm:$0xff]  ;;  %v203_v43 = vsub.s32 1, %v198_v42  ;;  %v199_v54 = vsub.s32 0, %v198_v42  ;;  %p461_p6 = scmp.ne.s32.totalorder %s319_s25, %s460_s26  ;;  %p466_p8 = scmp.lt.s32.totalorder %s460_s26, %s460_s26 }
  0x3a   :  { %354 = vmatmul.mubr.msk.f32.vlgmr.msra.gmra.mxu0 %vm88_vm1, %v78_v3  ;;  %209 = vmatprep.subr.mxu1 %v192_v6  ;;  %v183_v15 = vld [vmem:[#allocation7 + $0xa0] sm:$0xff]  ;;  %v182_v16 = vld [vmem:[#allocation7 + $0x98] sm:$0xff]  ;;  %v181_v17 = vld [vmem:[#allocation7 + $0x90] sm:$0xff] }
  0x3b   :  { %210 = vmatpush1.msra.mxu1 %v191_v7  ;;  %v180_v18 = vld [vmem:[#allocation7 + $0x88] sm:$0xff]  ;;  %v179_v19 = vld [vmem:[#allocation7 + $0x80] sm:$0xff]  ;;  %v178_v20 = vld [vmem:[#allocation7 + $0x78] sm:$0xff]  ;;  %p467_p9 = por %p466_p8, %p465_p7 }
  0x3c   :  { %211 = vmatprep.subr.mxu1 %v190_v8  ;;  %v177_v21 = vld [vmem:[#allocation7 + $0x70] sm:$0xff]  ;;  %v176_v22 = vld [vmem:[#allocation7 + $0x68] sm:$0xff]  ;;  %v175_v23 = vld [vmem:[#allocation7 + $0x60] sm:$0xff] }
  0x3d   :  { %212 = vmatpush1.msra.mxu1 %v189_v9  ;;  %v174_v24 = vld [vmem:[#allocation7 + $0x58] sm:$0xff]  ;;  %v173_v25 = vld [vmem:[#allocation7 + $0x50] sm:$0xff]  ;;  %v172_v26 = vld [vmem:[#allocation7 + $0x48] sm:$0xff]  ;;  %p468_p10 = pnand %p467_p9, %p461_p6 }
  0x3e   :  { %213 = vmatprep.subr.mxu1 %v188_v10  ;;  %v171_v27 = vld [vmem:[#allocation7 + $0x40] sm:$0xff]  ;;  %v170_v28 = vld [vmem:[#allocation7 + $0x38] sm:$0xff]  ;;  %v169_v29 = vld [vmem:[#allocation7 + $0x30] sm:$0xff] }
  0x3f   :  { %214 = vmatpush1.msra.mxu1 %v187_v11  ;;  %v168_v30 = vld [vmem:[#allocation7 + $0x28] sm:$0xff]  ;;  %v167_v31 = vld [vmem:[#allocation7 + $0x20] sm:$0xff]  ;;  %v166_v32 = vld [vmem:[#allocation7 + $0x18] sm:$0xff] }
  0x40   :  { %215 = vmatprep.subr.mxu1 %v186_v12  ;;  %v165_v33 = vld [vmem:[#allocation7 + $0x10] sm:$0xff]  ;;  %v164_v34 = vld [vmem:[#allocation7 + $0x8] sm:$0xff]  ;;  %v163_v35 = vld [vmem:[#allocation7] sm:$0xff] }
  0x41   :  { %216 = vmatpush1.msra.mxu1 %v185_v13  ;;  %v343_v36 = vld [vmem:[%s588_s2] ss:$0 sm:$0xff]  ;;  %v195_v44 = vld [vmem:[#allocation8] sm:$0x3] }
  0x42   :  { %217 = vmatprep.subr.mxu1 %v184_v14  ;;  %v204_v45 = vrot.slane %v195_v44, %v203_v43  ;;  %v200_v58 = vrot.slane %v195_v44, %v199_v54  ;;  %v292_v61 = vld [vmem:[%s591_s5] sm:$0xff] }
  0x43   :  { %218 = vmatpush1.msra.mxu1 %v183_v15 }
  0x44   :  { %219 = vmatprep.subr.mxu1 %v182_v16 }
  0x45   :  { %220 = vmatpush1.msra.mxu1 %v181_v17 }
  0x46   :  { %221 = vmatprep.subr.mxu1 %v180_v18 }
  0x47   :  { %222 = vmatpush1.msra.mxu1 %v179_v19 }
  0x48   :  { %223 = vmatprep.subr.mxu1 %v178_v20 }
  0x49   :  { %224 = vmatpush1.msra.mxu1 %v177_v21 }
  0x4a   :  { %225 = vmatprep.subr.mxu1 %v176_v22 }
  0x4b   :  { %226 = vmatpush1.msra.mxu1 %v175_v23 }
  0x4c   :  { %227 = vmatprep.subr.mxu1 %v174_v24 }
  0x4d   :  { %228 = vmatpush1.msra.mxu1 %v173_v25 }
  0x4e   :  { %229 = vmatprep.subr.mxu1 %v172_v26 }
  0x4f   :  { %230 = vmatpush1.msra.mxu1 %v171_v27 }
  0x50   :  { %231 = vmatprep.subr.mxu1 %v170_v28 }
  0x51   :  { %232 = vmatpush1.msra.mxu1 %v169_v29 }
  0x52   :  { %233 = vmatprep.subr.mxu1 %v168_v30 }
  0x53   :  { %234 = vmatpush1.msra.mxu1 %v167_v31 }
  0x54   :  { %235 = vmatprep.subr.mxu1 %v166_v32 }
  0x55   :  { %236 = vmatpush1.msra.mxu1 %v165_v33 }
  0x56   :  { %237 = vmatprep.subr.mxu1 %v164_v34 }
  0x57   :  { %238 = vmatpush1.msra.mxu1 %v163_v35 }
  0xfa   :  { %v158_v37 = vpop.f32.mrf.mxu0 }
  0xfb   :  { %v159_v38 = vadd.f32 %v343_v36, %v158_v37 }
  0xfc   :  { %v355_v39 = vpop.f32.mrf.mxu0 }
  0xfd   :  { %v162_v40 = vmax.f32 %v159_v38, 0.0 }
  0xff   :  { %272 = vmatmul.mubr.f32.vlgmr.msra.gmra.mxu1 %v162_v40 }
 0x1bf   :  { %v273_v46 = vpop.f32.mrf.mxu1 }
 0x1c0   :  { %v274_v0 = vadd.f32 %v273_v46, %v200_v58 }
 0x1c1   :  { %v275_v47 = vpop.f32.mrf.mxu1 }
 0x1c2   :  { %v276_v48 = vadd.f32 %v275_v47, %v204_v45 }
 0x1c4   :  { %v279_v49 = vmin.f32 %v276_v48, 20.0  ;;  %vm278_vm3 = vcmp.gt.f32.partialorder %v276_v48, 20.0 }
 0x1c6   :  { %v280_v50 = vmul.f32 1.442695, %v279_v49 }
 0x1c8   :  { %368 = vpow2.f32 %v280_v50 }
 0x1d5   :  { %v369_v51 = vpop.eup %368 }
 0x1d6   :  { %v282_v52 = vadd.f32 1.0, %v369_v51  ;;  %v285_v53 = vmul.f32 -0.5, %v369_v51  ;;  %v288_v56 = vand.u32 2147483647, %v369_v51 }
 0x1d8   :  { %370 = vlog2.f32 %v282_v52  ;;  %v286_v55 = vadd.f32 1.0, %v285_v53  ;;  %vm289_vm2 = vcmp.lt.f32.partialorder %v288_v56, 0.0004427343 }
 0x1da   :  { %v287_v60 = vmul.f32 %v369_v51, %v286_v55 }
 0x1e5   :  { %v371_v57 = vpop.eup %370 }
 0x1e6   :  { %v284_v59 = vmul.f32 0.6931472, %v371_v57 }
 0x1e8   :  { %v290_v62 = vsel %vm289_vm2, %v287_v60, %v284_v59 }
 0x1e9   :  { %v291_v63 = vsel %vm278_vm3, %v276_v48, %v290_v62 }
 0x1ea   :  { %v293_v1 = vmul.f32 %v292_v61, %v291_v63 }
 0x1ec   :  { %v294_v2 = vadd.f32 %v293_v1, %v274_v0 }
 0x1ee   :  { %372 = vtanh.f32 %v294_v2 }
 0x1fb   :  { %v373_v3 = vpop.eup %372 }
 0x1fc   :  { %v309_v4 = vmul.f32 2.0, %v373_v3  ;;  %374 = vtanh.f32 %v373_v3 }
 0x1fe   :  { %310 = vst [vmem:[#allocation10] sm:$0xff] %v309_v4 }
 0x1ff   :  { %471 = shalt.err (!%p468_p10)
}
 0x200   :  { %321 = dma.vmem_to_hbm [thread:$0]  %s319_s25, 128, %s592_s6, [#allocation4]   ;;  %376 = vlog2.f32 %v291_v63  ;;  %v295_v9 = vmul.f32 %v292_v61, %v292_v61 }
 0x201   :  { %s521_s28 = smov [#allocation11]  }
 0x202   :  { %v296_v11 = vmul.f32 -0.5, %v295_v9  ;;  %s328_s29 = sshll.u32 %s521_s28, 4  ;;  %s329_s29 = int_to_ptr.vmem [resolvable:$true] %s328_s29 }
 0x203   :  { %s480_s6 = scalar_lea.vmem %s329_s29, 128  ;;  %p485_p12 = scmp.lt.s32.totalorder %s329_s29, %s329_s29 }
 0x204   :  { %p481_p11 = scmp.ne.s32.totalorder %s329_s29, %s480_s6  ;;  %p486_p13 = scmp.lt.s32.totalorder %s480_s6, %s480_s6 }
 0x206   :  { %p487_p0 = por %p486_p13, %p485_p12 }
 0x208   :  { %p488_p1 = pnand %p487_p0, %p481_p11 }
 0x209   :  { %v375_v5 = vpop.eup %374 }
 0x20a   :  { %v303_v6 = vmul.f32 %v375_v5, %v375_v5 }
 0x20c   :  { %v304_v7 = vsub.f32 1.0, %v303_v6 }
 0x20d   :  { %v377_v10 = vpop.eup %376 }
 0x20e   :  { %v305_v8 = vadd.f32 1e-07, %v304_v7  ;;  %v298_v12 = vmul.f32 0.6931472, %v377_v10 }
 0x210   :  { %378 = vlog2.f32 %v305_v8  ;;  %v299_v13 = vsub.f32 %v296_v11, %v298_v12 }
 0x212   :  { %v345_v15 = vadd.f32 -0.9189385, %v299_v13 }
 0x21d   :  { %v379_v14 = vpop.eup %378 }
 0x21e   :  { %v307_v16 = vmul.f32 0.6931472, %v379_v14 }
 0x220   :  { %v308_v17 = vsub.f32 %v345_v15, %v307_v16 }
 0x222   :  { %311 = vst [vmem:[#allocation11] sm:$0xff] %v308_v17 }
 0x223   :  { %491 = shalt.err (!%p488_p1)
}
 0x224   :  { %331 = dma.vmem_to_hbm [thread:$0]  %s329_s29, 128, %s593_s7, [#allocation12]  }
 0x225   :  { %506 = dma.done.wait [#allocation4], 128  }
 0x226   :  { %507 = vsyncadd [#allocation4], 4294967168 }
 0x227   :  { %508 = dma.done.wait [#allocation12], 128  }
 0x228   :  { %509 = vsyncadd [#allocation12], 4294967168 }
 0x229   :  { %338 = vsyncpa [#allocation3], 1 }
 0x22a   :  { %339 = vsyncpa [#allocation6], 1 }
 0x22b   :  { %340 = vsyncpa [#allocation9], 1 }
 0x22c   :  { %341 = vsyncpa [#allocation4], 1 }
 0x22d   :  { %342 = vsyncpa [#allocation12], 1 }

</bundles_post_ra>
